<compile_context>
chip_gen: v5e
topology: v5e:2x2
jax: 0.10.0
libtpu: 0.0.40
codegen_flags: <defaults>
</compile_context>

<pallas_src>
import math
import functools

import jax
import jax.numpy as jnp
from jax.experimental import pallas as pl
from jax.experimental.pallas import tpu as pltpu

_MIB = 1024 * 1024


def _pe_add_kernel(x_ref, pe_ref, o_ref):
    # x_ref: (TS, B, D); pe_ref: (TS, D) dense f32 slice of the table.
    # Upcast the add to f32 (PyTorch adds an f32 buffer) and cast on store.
    # The batch (sublane-axis) broadcast is VPU/XLU work hidden under DMA.
    y = x_ref[...].astype(jnp.float32) + pe_ref[...][:, None, :]
    o_ref[...] = y.astype(o_ref.dtype)


def _pe_add_dropout_kernel(x_ref, pe_ref, bits_ref, o_ref, *, threshold, scale):
    # Inverted dropout: drop iff bits < p * 2^32, keep -> scale by 1/(1-p).
    y = x_ref[...].astype(jnp.float32) + pe_ref[...][:, None, :]
    keep = bits_ref[...] >= jnp.uint32(threshold)
    y = jnp.where(keep, y * jnp.float32(scale), jnp.float32(0.0))
    o_ref[...] = y.astype(o_ref.dtype)


def _generation_targets():
    """Return (target x-block bytes, scoped-VMEM limit bytes) per TPU generation."""
    try:
        kind = jax.devices()[0].device_kind.lower()
    except Exception:
        kind = ""
    if ("v5 lite" in kind) or ("v5e" in kind) or ("v5lite" in kind):
        # v5e: ~0.82 TB/s HBM, 16 MiB default scoped VMEM -> 4 MiB blocks are
        # the sweet spot; raise the scoped limit modestly.
        return 4 * _MIB, 28 * _MIB
    # v6e / v7x / unknown: 8 MiB blocks; ~48 MiB scoped VMEM fits v7x's 64 MiB
    # physical VMEM with headroom and is trivially fine on v6e (128 MiB).
    return 8 * _MIB, 48 * _MIB


def _pick_seq_tile(S, B, D, x_itemsize, *, with_bits, target_block_bytes,
                   vmem_limit_bytes):
    """Largest multiple-of-8 sequence tile hitting the per-generation block
    target while keeping double-buffered live VMEM under the scoped limit."""
    row_x = max(B * D * x_itemsize, 1)
    row_pe = D * 4
    row_bits = B * D * 4 if with_bits else 0
    # live ~= 2x (x in) + 2x (out) + 2x (pe) [+ 2x (bits)] per seq row.
    live_per_row = 2 * (2 * row_x + row_pe + row_bits)
    budget_rows = max((vmem_limit_bytes - 2 * _MIB) // live_per_row, 8)
    target_rows = max(target_block_bytes // row_x, 8)
    ts = min(int(budget_rows), int(target_rows))
    ts = max((ts // 8) * 8, 8)
    s_pad = ((S + 7) // 8) * 8          # ragged last block is masked by Pallas
    return min(ts, s_pad)


class PositionalEncoding:
    """JAX/Pallas port of the PyTorch PositionalEncoding module."""

    def __init__(self, d_model, dropout=0.1, max_len=5000):
        assert 0.0 <= float(dropout) <= 1.0
        self.p = float(dropout)
        self.d_model = int(d_model)
        position = jnp.arange(0, max_len, dtype=jnp.float32)[:, None]        # (L, 1)
        div_term = jnp.exp(
            jnp.arange(0, d_model, 2, dtype=jnp.float32)
            * (-math.log(10000.0) / d_model)
        )                                                                     # (D/2,)
        pe = jnp.zeros((max_len, d_model), dtype=jnp.float32)
        pe = pe.at[:, 0::2].set(jnp.sin(position * div_term))
        pe = pe.at[:, 1::2].set(jnp.cos(position * div_term))
        # Dense (max_len, D) f32 table: no padded size-1 sublane dim in HBM,
        # no per-call slice/cast on the hot path (BlockSpec picks the rows).
        self.pe = pe

    def __call__(self, x, *, training=False, seed=0):
        S, B, D = x.shape
        assert S <= self.pe.shape[0], "sequence longer than max_len"
        assert D == self.pe.shape[1], "d_model mismatch"

        if training and self.p >= 1.0:
            # nn.Dropout(p=1.0) zeroes everything in training mode.
            return jnp.zeros_like(x)

        use_dropout = training and self.p > 0.0
        itemsize = jnp.dtype(x.dtype).itemsize
        target_block, vmem_limit = _generation_targets()
        ts = _pick_seq_tile(S, B, D, itemsize, with_bits=use_dropout,
                            target_block_bytes=target_block,
                            vmem_limit_bytes=vmem_limit)
        grid = (pl.cdiv(S, ts),)

        # x/out blocks: last-two dims (B, D) equal the full array dims, so the
        # (8,128) rule always holds; pe block (ts, D) has ts % 8 == 0 and full D.
        # TODO(synk): for very small batch (B < 8 f32 / 16 bf16) a batch-leading
        # (B, S, D) layout would avoid sublane padding on the x/out stream.
        x_spec = pl.BlockSpec((ts, B, D), lambda i: (i, 0, 0))
        pe_spec = pl.BlockSpec((ts, D), lambda i: (i, 0))
        out_spec = pl.BlockSpec((ts, B, D), lambda i: (i, 0, 0))

        # TODO(synk): verify on v7x that "parallel" actually shards the seq axis
        # across both TensorCores; switch to pltpu.CORE_PARALLEL if xprof shows
        # a single core streaming.
        cparams = pltpu.CompilerParams(
            dimension_semantics=("parallel",),
            vmem_limit_bytes=int(vmem_limit),
        )

        x_bytes = S * B * D * itemsize
        pe_bytes = S * D * 4

        if not use_dropout:
            # Eval mode (or p == 0): dropout is identity.
            cost = pl.CostEstimate(flops=S * B * D, transcendentals=0,
                                   bytes_accessed=2 * x_bytes + pe_bytes)
            return pl.pallas_call(
                _pe_add_kernel,
                out_shape=jax.ShapeDtypeStruct((S, B, D), x.dtype),
                grid_spec=pl.GridSpec(grid=grid,
                                      in_specs=[x_spec, pe_spec],
                                      out_specs=out_spec),
                compiler_params=cparams,
                cost_estimate=cost,
                input_output_aliases={0: 0},   # output may reuse x's HBM buffer
            )(x, self.pe)

        # Training mode: inverted dropout.  Random bits are drawn with
        # jax.random and streamed through the kernel as uint32 -- portable
        # (the generic interpret lowering has no rule for the TPU hardware
        # PRNG primitives, which crashed the previous version).
        # TODO(synk): on real Mosaic hardware an in-kernel
        # pltpu.prng_seed/prng_random_bits path would save this extra
        # (S,B,D) uint32 HBM stream; it also cannot bit-match torch's RNG.
        threshold = min(int(round(self.p * 4294967296.0)), 4294967295)
        scale = 1.0 / (1.0 - self.p)
        bits = jax.random.bits(jax.random.PRNGKey(seed), (S, B, D),
                               dtype=jnp.uint32)
        bits_spec = pl.BlockSpec((ts, B, D), lambda i: (i, 0, 0))
        kernel = functools.partial(_pe_add_dropout_kernel,
                                   threshold=threshold, scale=scale)
        cost = pl.CostEstimate(flops=2 * S * B * D, transcendentals=0,
                               bytes_accessed=2 * x_bytes + pe_bytes
                               + S * B * D * 4)
        return pl.pallas_call(
            kernel,
            out_shape=jax.ShapeDtypeStruct((S, B, D), x.dtype),
            grid_spec=pl.GridSpec(grid=grid,
                                  in_specs=[x_spec, pe_spec, bits_spec],
                                  out_specs=out_spec),
            compiler_params=cparams,
            cost_estimate=cost,
            input_output_aliases={0: 0},
        )(x, self.pe, bits)


if __name__ == "__main__":
    # Small deterministic example consistent with the module's forward:
    # x: (seq_len=8, batch=2, d_model=32), seq-first layout.
    key = jax.random.PRNGKey(0)
    seq_len, batch, d_model = 8, 2, 32
    x = jax.random.normal(key, (seq_len, batch, d_model), dtype=jnp.float32)

    module = PositionalEncoding(d_model=d_model, dropout=0.1, max_len=64)
    ref = x + module.pe[:seq_len][:, None, :]   # exact reference for the add

    # Eval-mode forward (dropout == identity).
    out = jax.block_until_ready(module(x, training=False))
    assert out.shape == (seq_len, batch, d_model)
    assert out.dtype == x.dtype
    assert jnp.allclose(out, ref, atol=1e-6, rtol=1e-6), "eval mismatch vs reference"

    # Training-mode forward: every element is either dropped (exactly 0) or
    # equals (x + pe) / (1 - p) (inverted dropout).  Randomness comes from
    # jax.random, so only this structural property is checked.
    p = module.p
    out_tr = jax.block_until_ready(module(x, training=True, seed=123))
    assert out_tr.shape == (seq_len, batch, d_model)
    assert out_tr.dtype == x.dtype
    kept_val = ref / (1.0 - p)
    ok = (out_tr == 0) | (jnp.abs(out_tr - kept_val)
                          <= 1e-5 + 1e-5 * jnp.abs(kept_val))
    assert bool(jnp.all(ok)), "training-mode dropout output inconsistent"

    print("KERNEL_OK")
</pallas_src>

<mosaic_0001>
module attributes {stable_mosaic.version = 11 : i64} {
  func.func @_pe_add_kernel(%arg0: i32, %arg1: memref<8x2x32xf32, #tpu.memory_space<vmem>>, %arg2: memref<8x32xf32, #tpu.memory_space<vmem>>, %arg3: memref<8x2x32xf32, #tpu.memory_space<vmem>>) attributes {dimension_semantics = [#tpu.dimension_semantics<parallel>], iteration_bounds = array<i64: 1>, scalar_prefetch = 0 : i64, scratch_operands = 0 : i64, tpu.core_type = #tpu.core_type<tc>, window_params = [{transform_indices = @transform_0, window_bounds = array<i64: 8, 2, 32>}, {transform_indices = @transform_1, window_bounds = array<i64: 8, 32>}, {transform_indices = @transform_2, window_bounds = array<i64: 8, 2, 32>}]} {
    %c0 = arith.constant 0 : index
    %c0_0 = arith.constant 0 : index
    %c0_1 = arith.constant 0 : index
    %0 = vector.load %arg1[%c0, %c0_0, %c0_1] : memref<8x2x32xf32, #tpu.memory_space<vmem>>, vector<8x2x32xf32>
    %c0_2 = arith.constant 0 : index
    %c0_3 = arith.constant 0 : index
    %1 = vector.load %arg2[%c0_2, %c0_3] : memref<8x32xf32, #tpu.memory_space<vmem>>, vector<8x32xf32>
    %2 = vector.shape_cast %1 : vector<8x32xf32> to vector<8x1x32xf32>
    %3 = vector.broadcast %2 : vector<8x1x32xf32> to vector<8x2x32xf32>
    %4 = arith.addf %0, %3 : vector<8x2x32xf32>
    %c0_4 = arith.constant 0 : index
    %c0_5 = arith.constant 0 : index
    %c0_6 = arith.constant 0 : index
    %5 = vector.load %arg3[%c0_4, %c0_5, %c0_6] : memref<8x2x32xf32, #tpu.memory_space<vmem>>, vector<8x2x32xf32>
    tpu.vector_store %arg3[%c0_4, %c0_5, %c0_6], %4 {strides = array<i32>} : memref<8x2x32xf32, #tpu.memory_space<vmem>>, vector<8x2x32xf32>,
    return
  }
  func.func @transform_0(%arg0: i32) -> (i32, i32, i32) {
    %c0_i32 = arith.constant 0 : i32
    %c0_i32_0 = arith.constant 0 : i32
    %c0_i32_1 = arith.constant 0 : i32
    return %arg0, %c0_i32, %c0_i32_0 : i32, i32, i32
  }
  func.func @transform_1(%arg0: i32) -> (i32, i32) {
    %c0_i32 = arith.constant 0 : i32
    %c0_i32_0 = arith.constant 0 : i32
    return %arg0, %c0_i32 : i32, i32
  }
  func.func @transform_2(%arg0: i32) -> (i32, i32, i32) {
    %c0_i32 = arith.constant 0 : i32
    %c0_i32_0 = arith.constant 0 : i32
    %c0_i32_1 = arith.constant 0 : i32
    return %arg0, %c0_i32, %c0_i32_0 : i32, i32, i32
  }
}

</mosaic_0001>

<bundles_post_ra>
// kernel: tpu_custom_call.1
= control target key start
LH: loop header
LB: loop body
LE: loop exit
PB: predicated region body
PF: predicated region fallthrough
CT: control target
= control target key end

     0   :  { %7 = vsyncpa [#allocation3], 0  ;;  %s195_s0 = inlined_call_operand.hbm [shape: f32[8,2,32], index: 0, kind: input, shape index: {}, may-alias: {0,2}]   ;;  %s196_s1 = inlined_call_operand.vmem [shape: f32[64,32], index: 1, kind: input, shape index: {}]   ;;  %s197_s2 = inlined_call_operand.hbm [shape: f32[8,2,32], index: 2, kind: output, shape index: {}, may-alias: {0,2}]  }
   0x1   :  { %8 = vsyncpa [#allocation4], 0  ;;  %s13_s11 = sshll.u32 %s195_s0, 4  ;;  %s153_s12 = smov [#allocation2]   ;;  %s14_s11 = int_to_ptr.hbm [resolvable:$true] %s13_s11 }
   0x2   :  { %s15_s13 = sshll.u32 %s153_s12, 4  ;;  %s154_s14 = smov 32   ;;  %s16_s13 = int_to_ptr.vmem [resolvable:$true] %s15_s13 }
   0x3   :  { %s155_s15 = smov 2  }
   0x4   :  { %21 = dma.hbm_to_vmem [thread:$0]  %s14_s11, 256, %s16_s13, [#allocation3], %s154_s14, %s154_s14, %s155_s15  }
   0x5   :  { %149 = dma.done.wait [#allocation3], 256  }
   0x6   :  { %150 = vsyncadd [#allocation3], 4294967040  ;;  %v28_v0 = vld [vmem:[#allocation2] sm:$0x3]  ;;  %vm69_vm0 = vcmask 254976   ;;  %s156_s0 = smov [#allocation5]  }
   0x7   :  { %v36_v1 = vld [vmem:[%s196_s1] sm:$0xff]  ;;  %v32_v15 = vld [vmem:[#allocation2 + $0x8] sm:$0x3]  ;;  %v33_v17 = vld [vmem:[#allocation2 + $0xa] sm:$0x3]  ;;  %s82_s1 = sshll.u32 %s156_s0, 4  ;;  %s83_s1 = int_to_ptr.vmem [resolvable:$true] %s82_s1 }
   0x8   :  { %v45_v2 = vperm.slane %v36_v1, 0  ;;  %v29_v3 = vld [vmem:[#allocation2 + $0x2] sm:$0x3]  ;;  %v38_v4 = vrot.slane %v36_v1, 1  ;;  %v39_v5 = vrot.slane %v36_v1, 2  ;;  %v40_v6 = vrot.slane %v36_v1, 3 }
   0x9   :  { %v30_v7 = vld [vmem:[#allocation2 + $0x4] sm:$0x3]  ;;  %v31_v8 = vld [vmem:[#allocation2 + $0x6] sm:$0x3]  ;;  %v41_v9 = vrot.slane %v36_v1, 4  ;;  %v42_v10 = vrot.slane %v36_v1, 5 }
   0xa   :  { %v61_v11 = vadd.f32 %v45_v2, %v28_v0  ;;  %v46_v12 = vperm.slane %v38_v4, 0  ;;  %v47_v13 = vperm.slane %v39_v5, 0  ;;  %v48_v14 = vperm.slane %v40_v6, 0  ;;  %v34_v24 = vld [vmem:[#allocation2 + $0xc] sm:$0x3]  ;;  %s84_s20 = sshll.u32 %s197_s2, 4  ;;  %s85_s20 = int_to_ptr.hbm [resolvable:$true] %s84_s20 }
   0xb   :  { %v49_v16 = vperm.slane %v41_v9, 0  ;;  %v50_v18 = vperm.slane %v42_v10, 0  ;;  %v43_v19 = vrot.slane %v36_v1, 6  ;;  %v44_v20 = vrot.slane %v36_v1, 7  ;;  %v35_v27 = vld [vmem:[#allocation2 + $0xe] sm:$0x3] }
   0xc   :  { %70 = vst.msk [vmem:[#allocation5] sm:$0x3] %vm69_vm0, %v61_v11  ;;  %v62_v21 = vadd.f32 %v46_v12, %v29_v3  ;;  %v63_v22 = vadd.f32 %v47_v13, %v30_v7  ;;  %v64_v23 = vadd.f32 %v48_v14, %v31_v8 }
   0xd   :  { %v65_v25 = vadd.f32 %v49_v16, %v32_v15  ;;  %v51_v26 = vperm.slane %v43_v19, 0  ;;  %v52_v28 = vperm.slane %v44_v20, 0  ;;  %v66_v29 = vadd.f32 %v50_v18, %v33_v17 }
   0xe   :  { %71 = vst.msk [vmem:[#allocation5 + $0x2] sm:$0x3] %vm69_vm0, %v62_v21 }
   0xf   :  { %72 = vst.msk [vmem:[#allocation5 + $0x4] sm:$0x3] %vm69_vm0, %v63_v22  ;;  %v67_v30 = vadd.f32 %v51_v26, %v34_v24  ;;  %v68_v31 = vadd.f32 %v52_v28, %v35_v27 }
  0x10   :  { %73 = vst.msk [vmem:[#allocation5 + $0x6] sm:$0x3] %vm69_vm0, %v64_v23 }
  0x11   :  { %74 = vst.msk [vmem:[#allocation5 + $0x8] sm:$0x3] %vm69_vm0, %v65_v25 }
  0x12   :  { %75 = vst.msk [vmem:[#allocation5 + $0xa] sm:$0x3] %vm69_vm0, %v66_v29 }
  0x13   :  { %76 = vst.msk [vmem:[#allocation5 + $0xc] sm:$0x3] %vm69_vm0, %v67_v30 }
  0x14   :  { %77 = vst.msk [vmem:[#allocation5 + $0xe] sm:$0x3] %vm69_vm0, %v68_v31 }
  0x15   :  { %90 = dma.vmem_to_hbm [thread:$0]  %s83_s1, 256, %s85_s20, [#allocation4], %s154_s14, %s154_s14, %s155_s15  }
  0x16   :  { %151 = dma.done.wait [#allocation4], 256  }
  0x17   :  { %152 = vsyncadd [#allocation4], 4294967040 }
  0x18   :  { %95 = vsyncpa [#allocation3], 1 }
  0x19   :  { %96 = vsyncpa [#allocation4], 1 }

</bundles_post_ra>
